<compile_context>
chip_gen: v7x
topology: tpu7x:2x2x1
jax: 0.10.0
libtpu: 0.0.40
codegen_flags: <defaults>
</compile_context>

<pallas_src>
import functools

import jax
import jax.numpy as jnp
import numpy as np
from jax.experimental import pallas as pl
from jax.experimental.pallas import tpu as pltpu


def _round_up(x, m):
    return -(-x // m) * m


def _vmem_info():
    """Returns (vmem_capacity_bytes, is_small_vmem) with a conservative fallback."""
    try:
        info = pltpu.get_tpu_info()
        cap = int(info.vmem_capacity_bytes)
    except Exception:
        cap = 64 << 20          # conservative (v7x-sized) fallback
    return cap, cap < (100 << 20)


def _pick_node_tile(N, T, K, c_in, c_pad, c_out, in_itemsize, out_itemsize,
                    budget_bytes, prefer_multi_tile):
    """Largest node tile tn (divisor of N -> node-aligned blocks) whose
    estimated VMEM working set fits `budget_bytes` and whose lane extent tn*T
    is a multiple of 128 (or tn == N).  Returns (tn, footprint_bytes)."""
    c2 = 2 * c_out

    def footprint(tn):
        lanes = _round_up(tn * T, 128)
        # Small resident blocks (weights / bias / time-index), double-buffered.
        fixed = (2 * _round_up(c2, 8) * _round_up(K * c_pad, 128) * in_itemsize
                 + 2 * _round_up(c2, 8) * 128 * 4
                 + 2 * 8 * lanes * 4)
        # Streamed blocks (double-buffered) + in-kernel temporaries, with
        # (8,128) sublane/lane padding and real dtypes.
        per_lane = (2 * _round_up(c_in, 8) * in_itemsize      # x block
                    + 2 * _round_up(c_out, 8) * out_itemsize  # out block
                    + K * c_pad * in_itemsize                 # im2col slab
                    + _round_up(c2, 8) * 4                    # conv result (f32)
                    + _round_up(c_out, 8) * 4)                # gate/gtu temps (f32)
        return fixed + per_lane * lanes

    candidates = [d for d in range(1, N + 1)
                  if N % d == 0 and ((d * T) % 128 == 0 or d == N)]
    fitting = [d for d in candidates if footprint(d) <= budget_bytes]
    if fitting:
        tn = max(fitting)
        if prefer_multi_tile and N // tn < 2:
            # v7x only: keep >= 2 programs on the parallel axes so both TCs work.
            smaller = [d for d in fitting if N // d >= 2]
            if smaller:
                tn = max(smaller)
    else:
        tn = min(candidates)
    return tn, footprint(tn)


def _gtu_kernel(t_idx_ref, x_ref, w_ref, b_ref, out_ref, *, k_taps, c_pad):
    # t_idx_ref: (1, L)  int32   time position within each node (precomputed)
    # x_ref    : (1, C_in, L)    channels-first, lane-dense (L = tn*T)
    # w_ref    : (C2, K*c_pad)   im2col conv weights, taps 8-sublane padded
    # b_ref    : (C2, 1)  f32    causal-conv bias
    # out_ref  : (1, C_out, L)   lane-dense NCHW output slab
    xt = x_ref[0]                                    # (C_in, L) — no transpose
    c_in, L = xt.shape
    c2 = w_ref.shape[0]
    c_out = c2 // 2
    t_idx = t_idx_ref[...]                           # (1, L)

    pad_rows = c_pad - c_in
    pieces = []
    for k in range(k_taps):
        s = k_taps - 1 - k                           # causal left shift of tap k
        if s == 0:
            tap = xt
        else:
            # XLU lane rotation + mask: roll wraparound garbage AND cross-node
            # positions both have t_idx < s, so one select handles both.
            tap = jnp.where(t_idx >= s,
                            pltpu.roll(xt, shift=s, axis=1),
                            jnp.zeros_like(xt))
        if pad_rows:
            # Pad each tap to an 8-sublane-aligned height so the stack below is
            # a pure layout op; the matching zero weight columns make the extra
            # rows free on the MXU.
            tap = jnp.concatenate(
                [tap, jnp.zeros((pad_rows, L), dtype=tap.dtype)], axis=0)
        pieces.append(tap)
    slab = pieces[0] if k_taps == 1 else jnp.concatenate(pieces, axis=0)

    # Single MXU pass: (C2, K*c_pad) @ (K*c_pad, L) -> (C2, L), f32 accumulate.
    conv = jnp.dot(w_ref[...], slab, preferred_element_type=jnp.float32)
    conv = conv + b_ref[...]                         # (C2, 1) f32 broadcast

    x_p = conv[:c_out, :]
    x_q = conv[c_out:, :]
    # sigmoid(x) == 0.5*(1 + tanh(x/2)): one EUP tanh instead of exp + recip.
    gate = 0.5 * (1.0 + jnp.tanh(0.5 * x_q))
    gtu = jnp.tanh(x_p) * gate                       # (C_out, L) f32

    # Reference blend w*gtu + (1-w)*gtu is the identity -> gating branch elided.
    out_ref[0] = gtu.astype(out_ref.dtype)


def gtu_forward(x, conv_w, conv_b, w_conv_w, w_conv_b):
    """x: (B, N, T, C_in) — the module input before its internal permute.
    Returns PyTorch-layout (B, C_out, N, T) in x.dtype."""
    B, N, T, C_in = x.shape
    C2, _, _, K = conv_w.shape
    C_out = C2 // 2
    NT = N * T

    # TODO(synk): w_conv_w / w_conv_b only feed w*gtu + (1-w)*gtu == gtu and the
    # Align submodule is unused in forward, so neither is materialized here.
    del w_conv_w, w_conv_b

    in_dtype = x.dtype
    in_itemsize = jnp.dtype(in_dtype).itemsize
    sublane_align = max(8, 32 // in_itemsize)        # 8 for f32, 16 for bf16
    C_pad = _round_up(C_in, sublane_align)

    vmem_cap, small_vmem = _vmem_info()
    if small_vmem:          # v7x: 64 MiB / TC, both cores resident via parallel grid
        budget = 7 << 20
        vmem_cap_limit = 48 << 20
    else:                   # v5e / v6e: 128 MiB physical VMEM -> big tiles
        budget = 14 << 20
        vmem_cap_limit = 64 << 20

    tn, footprint = _pick_node_tile(
        N, T, K, C_in, C_pad, C_out, in_itemsize, in_itemsize,
        budget_bytes=budget,
        prefer_multi_tile=(small_vmem and B == 1))
    # Node-boundary causality relies on every tile holding whole nodes.
    assert N % tn == 0, "node tile must divide N (causal-mask invariant)"
    L = tn * T

    vmem_limit = int(min(max(32 << 20, 2 * footprint), vmem_cap_limit))
    if footprint > vmem_limit:
        raise ValueError(
            f"GTU Pallas kernel: smallest legal node tile (tn={tn}) needs "
            f"~{footprint >> 20} MiB VMEM, exceeding the {vmem_limit >> 20} MiB limit.")

    # Channels-first, lane-dense input slab (B, C_in, N*T).  This is exactly the
    # module's own x.permute(0,3,1,2); fuse with the producer if it already
    # emits NCHW activations.
    x2 = jnp.transpose(x, (0, 3, 1, 2)).reshape(B, C_in, NT)

    # im2col weights, each tap zero-padded to C_pad rows:
    #   w2t[o, k*C_pad + c] = conv_w[o, c, 0, k]  (c < C_in),  0 otherwise.
    w_k = jnp.transpose(conv_w[:, :, 0, :], (0, 2, 1))        # (C2, K, C_in)
    if C_pad > C_in:
        w_k = jnp.pad(w_k, ((0, 0), (0, 0), (0, C_pad - C_in)))
    w2t = w_k.reshape(C2, K * C_pad).astype(in_dtype)
    b2 = conv_b.astype(jnp.float32).reshape(C2, 1)

    # Per-lane time index within a node; tiles are node-aligned, so one (1, L)
    # constant serves every grid step (no per-step iota/modulo in the kernel).
    t_idx = jnp.tile(jnp.arange(T, dtype=jnp.int32), tn).reshape(1, L)

    out = pl.pallas_call(
        functools.partial(_gtu_kernel, k_taps=K, c_pad=C_pad),
        out_shape=jax.ShapeDtypeStruct((B, C_out, NT), in_dtype),
        grid_spec=pltpu.PrefetchScalarGridSpec(
            num_scalar_prefetch=0,
            grid=(B, N // tn),
            in_specs=[
                pl.BlockSpec((1, L), lambda b, j: (0, 0)),
                pl.BlockSpec((1, C_in, L), lambda b, j: (b, 0, j)),
                pl.BlockSpec((C2, K * C_pad), lambda b, j: (0, 0)),
                pl.BlockSpec((C2, 1), lambda b, j: (0, 0)),
            ],
            out_specs=pl.BlockSpec((1, C_out, L), lambda b, j: (b, 0, j)),
        ),
        compiler_params=pltpu.CompilerParams(
            dimension_semantics=("parallel", "parallel"),
            vmem_limit_bytes=vmem_limit),
    )(t_idx, x2, w2t, b2)

    # (B, C_out, N*T) is already NCHW memory order -> free reshape, no transpose.
    return out.reshape(B, C_out, N, T)


def gtu_reference(x, conv_w, conv_b, w_conv_w, w_conv_b):
    """Pure-JAX reference mirroring the PyTorch forward exactly."""
    B, N, T, C_in = x.shape
    C2, _, _, K = conv_w.shape
    C_out = C2 // 2
    xn = jnp.transpose(x, (0, 3, 1, 2))                           # (B, C_in, N, T)
    xp = jnp.pad(xn, ((0, 0), (0, 0), (0, 0), (K - 1, 0)))        # causal pad on time
    conv = jax.lax.conv_general_dilated(
        xp, conv_w, window_strides=(1, 1), padding="VALID",
        dimension_numbers=("NCHW", "OIHW", "NCHW")) + conv_b.reshape(1, C2, 1, 1)
    x_p = conv[:, :C_out]
    x_q = conv[:, C_out:]
    gtu = jnp.tanh(x_p) * jax.nn.sigmoid(x_q)
    wl = jax.lax.conv_general_dilated(
        xn, w_conv_w, window_strides=(1, 1), padding="VALID",
        dimension_numbers=("NCHW", "OIHW", "NCHW")) + w_conv_b.reshape(1, 1, 1, 1)
    w = jnp.mean(jax.nn.sigmoid(wl), axis=-1, keepdims=True)      # (B, 1, N, 1)
    return w * gtu + (1.0 - w) * gtu


if __name__ == "__main__":
    B, N, T, C_in, C_out, K = 2, 8, 16, 4, 8, 3

    key = jax.random.PRNGKey(0)
    k1, k2, k3, k4, k5 = jax.random.split(key, 5)
    x = jax.random.normal(k1, (B, N, T, C_in), jnp.float32)
    conv_w = 0.1 * jax.random.normal(k2, (2 * C_out, C_in, 1, K), jnp.float32)
    conv_b = 0.1 * jax.random.normal(k3, (2 * C_out,), jnp.float32)
    w_conv_w = 0.1 * jax.random.normal(k4, (1, C_in, 1, 1), jnp.float32)
    w_conv_b = 0.1 * jax.random.normal(k5, (1,), jnp.float32)

    out = jax.block_until_ready(gtu_forward(x, conv_w, conv_b, w_conv_w, w_conv_b))
    ref = gtu_reference(x, conv_w, conv_b, w_conv_w, w_conv_b)

    assert out.shape == (B, C_out, N, T), out.shape
    np.testing.assert_allclose(np.asarray(out), np.asarray(ref),
                               rtol=1e-5, atol=1e-5)
    print("KERNEL_OK")
</pallas_src>

<mosaic_0001>
module attributes {stable_mosaic.version = 11 : i64} {
  func.func @_gtu_kernel(%arg0: i32, %arg1: i32, %arg2: memref<1x128xi32, #tpu.memory_space<vmem>>, %arg3: memref<1x4x128xf32, #tpu.memory_space<vmem>>, %arg4: memref<16x24xf32, #tpu.memory_space<vmem>>, %arg5: memref<16x1xf32, #tpu.memory_space<vmem>>, %arg6: memref<1x8x128xf32, #tpu.memory_space<vmem>>) attributes {dimension_semantics = [#tpu.dimension_semantics<parallel>, #tpu.dimension_semantics<parallel>], iteration_bounds = array<i64: 2, 1>, scalar_prefetch = 0 : i64, scratch_operands = 0 : i64, tpu.core_type = #tpu.core_type<tc>, window_params = [{pipeline_mode = #tpu.pipeline_mode<synchronous>, transform_indices = @transform_0, window_bounds = array<i64: 1, 128>}, {transform_indices = @transform_1, window_bounds = array<i64: 1, 4, 128>}, {pipeline_mode = #tpu.pipeline_mode<synchronous>, transform_indices = @transform_2, window_bounds = array<i64: 16, 24>}, {pipeline_mode = #tpu.pipeline_mode<synchronous>, transform_indices = @transform_3, window_bounds = array<i64: 16, 1>}, {transform_indices = @transform_4, window_bounds = array<i64: 1, 8, 128>}]} {
    %c0 = arith.constant 0 : index
    %c0_0 = arith.constant 0 : index
    %c0_1 = arith.constant 0 : index
    %0 = vector.load %arg3[%c0, %c0_0, %c0_1] : memref<1x4x128xf32, #tpu.memory_space<vmem>>, vector<1x4x128xf32>
    %1 = vector.shape_cast %0 : vector<1x4x128xf32> to vector<4x128xf32>
    %c0_2 = arith.constant 0 : index
    %c0_3 = arith.constant 0 : index
    %2 = vector.load %arg2[%c0_2, %c0_3] : memref<1x128xi32, #tpu.memory_space<vmem>>, vector<1x128xi32>
    %c2_i32 = arith.constant 2 : i32
    %3 = vector.broadcast %c2_i32 : i32 to vector<1x128xi32>
    %4 = arith.cmpi sge, %2, %3 : vector<1x128xi32>
    %c2_i32_4 = arith.constant 2 : i32
    %5 = tpu.dynamic_rotate %1 by %c2_i32_4 dim 1 : vector<4x128xf32>, i32 -> vector<4x128xf32>
    %cst = arith.constant 0.000000e+00 : f32
    %6 = vector.broadcast %cst : f32 to vector<4x128xf32>
    %7 = vector.shape_cast %4 : vector<1x128xi1> to vector<1x128xi1>
    %8 = vector.broadcast %7 : vector<1x128xi1> to vector<4x128xi1>
    %9 = arith.select %8, %5, %6 : vector<4x128xi1>, vector<4x128xf32>
    %cst_5 = arith.constant 0.000000e+00 : f32
    %10 = vector.broadcast %cst_5 : f32 to vector<4x128xf32>
    %11 = tpu.concatenate %9, %10 in 0 : vector<4x128xf32>, vector<4x128xf32> -> vector<8x128xf32>
    %c1_i32 = arith.constant 1 : i32
    %12 = vector.broadcast %c1_i32 : i32 to vector<1x128xi32>
    %13 = arith.cmpi sge, %2, %12 : vector<1x128xi32>
    %c1_i32_6 = arith.constant 1 : i32
    %14 = tpu.dynamic_rotate %1 by %c1_i32_6 dim 1 : vector<4x128xf32>, i32 -> vector<4x128xf32>
    %cst_7 = arith.constant 0.000000e+00 : f32
    %15 = vector.broadcast %cst_7 : f32 to vector<4x128xf32>
    %16 = vector.shape_cast %13 : vector<1x128xi1> to vector<1x128xi1>
    %17 = vector.broadcast %16 : vector<1x128xi1> to vector<4x128xi1>
    %18 = arith.select %17, %14, %15 : vector<4x128xi1>, vector<4x128xf32>
    %cst_8 = arith.constant 0.000000e+00 : f32
    %19 = vector.broadcast %cst_8 : f32 to vector<4x128xf32>
    %20 = tpu.concatenate %18, %19 in 0 : vector<4x128xf32>, vector<4x128xf32> -> vector<8x128xf32>
    %cst_9 = arith.constant 0.000000e+00 : f32
    %21 = vector.broadcast %cst_9 : f32 to vector<4x128xf32>
    %22 = tpu.concatenate %1, %21 in 0 : vector<4x128xf32>, vector<4x128xf32> -> vector<8x128xf32>
    %23 = tpu.concatenate %11, %20, %22 in 0 : vector<8x128xf32>, vector<8x128xf32>, vector<8x128xf32> -> vector<24x128xf32>
    %c0_10 = arith.constant 0 : index
    %c0_11 = arith.constant 0 : index
    %24 = vector.load %arg4[%c0_10, %c0_11] : memref<16x24xf32, #tpu.memory_space<vmem>>, vector<16x24xf32>
    %cst_12 = arith.constant dense<0.000000e+00> : vector<16x128xf32>
    %25 = tpu.matmul %24, %23, %cst_12 {dimension_numbers = #tpu.dot_dimension_numbers<[1], [0], [0], [1], [0, 0, 1, 1], [], []>} : vector<16x24xf32>, vector<24x128xf32>, vector<16x128xf32> -> vector<16x128xf32>
    %c0_13 = arith.constant 0 : index
    %c0_14 = arith.constant 0 : index
    %26 = vector.load %arg5[%c0_13, %c0_14] : memref<16x1xf32, #tpu.memory_space<vmem>>, vector<16x1xf32>
    %27 = vector.broadcast %26 : vector<16x1xf32> to vector<16x128xf32>
    %28 = arith.addf %25, %27 : vector<16x128xf32>
    %29 = vector.extract_strided_slice %28 {offsets = [0, 0], sizes = [8, 128], strides = [1, 1]} : vector<16x128xf32> to vector<8x128xf32>
    %30 = vector.extract_strided_slice %28 {offsets = [8, 0], sizes = [8, 128], strides = [1, 1]} : vector<16x128xf32> to vector<8x128xf32>
    %cst_15 = arith.constant 5.000000e-01 : f32
    %31 = vector.broadcast %cst_15 : f32 to vector<8x128xf32>
    %32 = arith.mulf %31, %30 : vector<8x128xf32>
    %33 = math.tanh %32 : vector<8x128xf32>
    %cst_16 = arith.constant 1.000000e+00 : f32
    %34 = vector.broadcast %cst_16 : f32 to vector<8x128xf32>
    %35 = arith.addf %34, %33 : vector<8x128xf32>
    %cst_17 = arith.constant 5.000000e-01 : f32
    %36 = vector.broadcast %cst_17 : f32 to vector<8x128xf32>
    %37 = arith.mulf %36, %35 : vector<8x128xf32>
    %38 = math.tanh %29 : vector<8x128xf32>
    %39 = arith.mulf %38, %37 : vector<8x128xf32>
    %c0_18 = arith.constant 0 : index
    %c0_19 = arith.constant 0 : index
    %c0_20 = arith.constant 0 : index
    %40 = vector.load %arg6[%c0_18, %c0_19, %c0_20] : memref<1x8x128xf32, #tpu.memory_space<vmem>>, vector<1x8x128xf32>
    %41 = vector.shape_cast %40 : vector<1x8x128xf32> to vector<8x128xf32>
    %42 = vector.shape_cast %39 : vector<8x128xf32> to vector<1x8x128xf32>
    tpu.vector_store %arg6[%c0_18, %c0_19, %c0_20], %42 {strides = array<i32>} : memref<1x8x128xf32, #tpu.memory_space<vmem>>, vector<1x8x128xf32>,
    return
  }
  func.func @transform_0(%arg0: i32, %arg1: i32) -> (i32, i32) {
    %c0_i32 = arith.constant 0 : i32
    %c0_i32_0 = arith.constant 0 : i32
    %c0_i32_1 = arith.constant 0 : i32
    return %c0_i32, %c0_i32_0 : i32, i32
  }
  func.func @transform_1(%arg0: i32, %arg1: i32) -> (i32, i32, i32) {
    %c0_i32 = arith.constant 0 : i32
    %c0_i32_0 = arith.constant 0 : i32
    return %arg0, %c0_i32, %arg1 : i32, i32, i32
  }
  func.func @transform_2(%arg0: i32, %arg1: i32) -> (i32, i32) {
    %c0_i32 = arith.constant 0 : i32
    %c0_i32_0 = arith.constant 0 : i32
    %c0_i32_1 = arith.constant 0 : i32
    return %c0_i32, %c0_i32_0 : i32, i32
  }
  func.func @transform_3(%arg0: i32, %arg1: i32) -> (i32, i32) {
    %c0_i32 = arith.constant 0 : i32
    %c0_i32_0 = arith.constant 0 : i32
    %c0_i32_1 = arith.constant 0 : i32
    return %c0_i32, %c0_i32_0 : i32, i32
  }
  func.func @transform_4(%arg0: i32, %arg1: i32) -> (i32, i32, i32) {
    %c0_i32 = arith.constant 0 : i32
    %c0_i32_0 = arith.constant 0 : i32
    return %arg0, %c0_i32, %arg1 : i32, i32, i32
  }
}

</mosaic_0001>

<bundles_post_ra>
// kernel: tpu_custom_call.1
= control target key start
LH: loop header
LB: loop body
LE: loop exit
PB: predicated region body
PF: predicated region fallthrough
CT: control target
= control target key end

     0   :  { %9 = vsyncpa [#allocation3], 0  ;;  %s877_s0 = inlined_call_operand.hbm [shape: s32[1,128], index: 0, kind: input, shape index: {}]   ;;  %s878_s1 = inlined_call_operand.vmem [shape: f32[2,4,128], index: 1, kind: input, shape index: {}]   ;;  %s879_s2 = inlined_call_operand.vmem [shape: f32[16,24], index: 2, kind: input, shape index: {}]   ;;  %s880_s3 = inlined_call_operand.vmem [shape: f32[16,1], index: 3, kind: input, shape index: {}]   ;;  %s881_s4 = inlined_call_operand.hbm [shape: f32[2,8,128], index: 4, kind: output, shape index: {}]  }
   0x1   :  { %10 = vsyncpa [#allocation4], 0 }
   0x2   :  { %12 = vsyncpa [#allocation4 + $0x1], 0  ;;  %s713_s15 = smov 0   ;;  %s715_s16 = smov 0  }
   0x3   :  { %s717_s17 = smov 0   ;;  %s719_s18 = smov 0  }
   0x4   :  { %s721_s19 = smov 0   ;;  %s723_s20 = smov 0  }
   0x5 LB: > { %s458_s21 = sadd.s32 4294967295, %s681_s20   ;;  %s459_s22 = sadd.s32 4294967294, %s681_s20   ;;  %s681_s20 = sphi %s723_s20, %s18_s20   ;;  %s677_s19 = sphi %s721_s19, %s899_s19   ;;  %s673_s18 = sphi %s719_s18, %s898_s18   ;;  %s669_s17 = sphi %s717_s17, %s897_s17   ;;  %s665_s16 = sphi %s715_s16, %s896_s16   ;;  %s661_s15 = sphi %s713_s15, %s895_s15  }
   0x6   : > { %s30_s23 = sadd.s32 1, %s677_s19  ;;  %s130_s24 = sadd.s32 1, %s669_s17 }
   0x7   : > { %p32_p0 = scmp.ge.s32.totalorder %s30_s23, 2  ;;  %p140_p1 = scmp.ne.s32.totalorder %s669_s17, %s665_s16 }
   0x8   : > { %p141_p2 = scmp.eq.s32.totalorder %s458_s21, 1  ;;  %p146_p3 = scmp.ne.s32.totalorder %s665_s16, %s661_s15 }
   0x9   : > { %s901_s23 = smov (%p32_p0, %s30_s23), 0  ;;  %p147_p5 = scmp.eq.s32.totalorder %s459_s22, 1 }
   0xa   : > { %p753_p4 = por %p141_p2, %p140_p1  ;;  %s125_s26 = ssub.s32 %s677_s19, %s901_s23 }
   0xb   : > { %p460_p6 = scmp.ge.s32.totalorder %s681_s20, 1  ;;  %p128_p7 = scmp.eq.s32.totalorder %s125_s26, 0 }
   0xc   : > { %s886_s25 = scalar_select %p753_p4, 1, 0 }
   0xd   : > { %p760_p8 = por %p147_p5, %p146_p3  ;;  %p154_p9 = scmp.lt.s32.totalorder %s681_s20, 3 }
   0xe   : > { %s766_s28 = scalar_select %p128_p7, %s669_s17, %s130_s24  }
   0xf   : > { %s887_s27 = scalar_select %p760_p8, 1, 0 }
  0x10   : > { %p768_p10 = pnand %p460_p6, %p154_p9  ;;  %p772_p11 = scmp.eq.s32.totalorder %s458_s21, 0 }
  0x11   : > { %s683_s5 = smov [#allocation2]   ;;  %s571_s10 = scalar_lea.hbm %s877_s0, 16 }
  0x12   : > { %s888_s29 = scalar_select %p768_p10, 1, 0 }
  0x13   : > { %s889_s30 = scalar_select %p772_p11, 1, 0 }
  0x14   : > { %p502_p12 = pneg %p768_p10  ;;  %s167_s6 = sshll.u32 %s683_s5, 4  ;;  %s168_s6 = int_to_ptr.vmem [resolvable:$true] %s167_s6 }
  0x15   : > { %p572_p0 = scmp.ne.s32.totalorder %s877_s0, %s571_s10  ;;  %p578_p5 = scmp.lt.u32.totalorder %s571_s10, %s877_s0 }
  0x16   : > { %p780_p13 = pnand %p772_p11, %p502_p12 }
  0x18   : > { %p573_p1 = pneg %p780_p13 }
  0x1a   : > { %p574_p2 = pnand %p573_p1, %p572_p0 }
  0x1c   : > { %p575_p3 = pneg %p574_p2 }
  0x1e   : > { %p580_p6 = pnand %p578_p5, %p575_p3 }
  0x20   : > { %583 = shalt.err (!%p580_p6)
}
  0x21   : > { %s584_s21 = scalar_lea.vmem %s168_s6, 16  ;;  %s591_s22 = scalar_lea.vmem %s168_s6, 32 }
  0x22   : > { %p585_p7 = scmp.ne.s32.totalorder %s168_s6, %s584_s21  ;;  %p592_p8 = scmp.lt.s32.totalorder %s168_s6, %s168_s6 }
  0x23   : > { %p593_p4 = scmp.lt.s32.totalorder %s591_s22, %s584_s21 }
  0x24   : > { %p587_p9 = pnand %p585_p7, %p573_p1 }
  0x25   : > { %p594_p11 = por %p593_p4, %p592_p8 }
  0x26   : > { %p588_p12 = pneg %p587_p9 }
  0x28   : > { %p595_p10 = pnand %p594_p11, %p588_p12 }
  0x2a   : > { %598 = shalt.err (!%p595_p10)
}
  0x2b   : > { %505 = dma.hbm_to_vmem [thread:$0]  (!%p780_p13), %s877_s0, 16, %s168_s6, [#allocation3]  }
  0x2c   : > { %p891_p0 = scmp.ne.s32.totalorder %s888_s29, 0 }
  0x2d   : > { %p892_p2 = scmp.ne.s32.totalorder (!%p891_p0), %s889_s30, 0 }
  0x2e   : > { %196 = sbr.rel (%p891_p0) target bundleno = 436 (0x1b4), region = 36 }
  0x35   : > { %652 = dma.done.wait (%p892_p2), [#allocation3], 16  }
  0x36   : > { %654 = vsyncadd (%p892_p2), [#allocation3], 4294967280  ;;  %p224_p4 = scmp.lt.s32.totalorder %s673_s18, 1  ;;  %v684_v0 = vmov 0   ;;  %vm271_vm0 = vcmask 195584   ;;  %v257_v2 = vld [vmem:[%s879_s2] sm:$0xff]  ;;  %v237_v5 = vlaneseq }
  0x37   : > { %565 = vset.pattern.permute.xlu1 %v684_v0  ;;  %566 = vset.pattern.permute.xlu0 %v684_v0  ;;  %s685_s30 = smov 2   ;;  %v260_v3 = vld [vmem:[%s880_s3 + $0x8] sm:$0xff]  ;;  %v259_v4 = vld [vmem:[%s880_s3] sm:$0xff]  ;;  %s686_s21 = smov 1   ;;  %vm243_vm5 = vcmask 1043456  }
  0x38   : > { %s225_s5 = scalar_select %p224_p4, %s673_s18, 1  ;;  %487 = vmatprep.mubr.msk.f32.mxu0 %vm271_vm0, %v257_v2  ;;  %268 = vperm.xlu1 %565, %v260_v3   ;;  %v232_v6 = vld [vmem:[#allocation2] sm:$0x1]  ;;  %v238_v7 = vshrl.u32 %v237_v5, 7  ;;  %vm491_vm6 = vmpackc.low %vm243_vm5, %vm243_vm5  ;;  %v258_v18 = vld [vmem:[%s879_s2 + $0x8] sm:$0xff] }
  0x39   : > { %vm233_vm1 = vcmp.ge.s32.totalorder %v232_v6, 2  ;;  %vm245_vm2 = vcmp.ge.s32.totalorder %v232_v6, 1  ;;  %s221_s26 = sand.u32 1, %s665_s16   ;;  %p893_p10 = scmp.ne.s32.totalorder %s886_s25, 0 }
  0x3a   : > { %s466_s7 = sshll.u32 %s225_s5, 2  ;;  %v239_v8 = vsub.s32 0, %v238_v7  ;;  %v236_v9 = vsel %vm233_vm1, 1, %v684_v0  ;;  %v248_v10 = vsel %vm245_vm2, 1, %v684_v0  ;;  %s465_s5 = sshll.u32 %s221_s26, 3 }
  0x3b   : > { %s230_s6 = scalar_lea.vmem %s878_s1, %s466_s7  ;;  %s473_s7 = sshll.u32 %s673_s18, 7 }
  0x3c   : > { %v231_v1 = vld [vmem:[%s230_s6] sm:$0xf]  ;;  %263 = vperm.xlu1 %565, %v259_v4   ;;  %v240_v11 = vrot.slane %v236_v9, %v239_v8  ;;  %v252_v12 = vrot.slane %v248_v10, %v239_v8  ;;  %s223_s8 = scalar_lea.vmem [#allocation5], %s465_s5  ;;  %s830_s10 = scalar_lea.hbm %s881_s4, %s473_s7 }
  0x3d   : > { %234 = vrot.lane.b32.xlu0 %v231_v1, %s685_s30  ;;  %s375_s9 = sshll.u32 %s223_s8, 4  ;;  %s361_s30 = scalar_lea.sflag [#allocation4], %s221_s26  ;;  %s832_s9 = int_to_ptr.vmem [resolvable:$true] %s375_s9 }
  0x3e   : > { %vm241_vm3 = vcmp.eq.s32.totalorder %v240_v11, 1  ;;  %vm253_vm4 = vcmp.eq.s32.totalorder %v252_v12, 1  ;;  %s599_s11 = scalar_lea.vmem %s832_s9, 128  ;;  %s687_s18 = smov [#allocation5]  }
  0x3f   : > { %p600_p8 = scmp.ne.s32.totalorder %s832_s9, %s599_s11  ;;  %s603_s12 = sshll.u32 %s687_s18, 4  ;;  %s604_s12 = int_to_ptr.vmem [resolvable:$false] %s603_s12 }
  0x40   : > { %s605_s13 = scalar_lea.vmem %s604_s12, 256  ;;  %p606_p1 = scmp.lt.s32.totalorder %s832_s9, %s604_s12 }
  0x41   : > { %246 = vrot.lane.b32.xlu0 %v231_v1, %s686_s21  ;;  %p601_p11 = pnand %p600_p8, %p893_p10  ;;  %p607_p3 = scmp.lt.s32.totalorder %s605_s13, %s599_s11 }
  0x43   : > { %p602_p13 = pneg %p601_p11  ;;  %p608_p5 = por %p607_p3, %p606_p1 }
  0x45   : > { %p609_p6 = pnand %p608_p5, %p602_p13 }
  0xaf   : > { %v235_v13 = vpop.permute.xlu0 %234 }
  0xb0   : > { %v242_v15 = vsel %vm241_vm3, %v235_v13, 0.0 }
  0xb3   : > { %v247_v14 = vpop.permute.xlu0 %246 }
  0xb4   : > { %v254_v16 = vsel %vm253_vm4, %v247_v14, 0.0 }
  0xb5   : > { %v490_v17 = vpack.c.bf16 %v254_v16, %v242_v15 }
  0xb7   : > { %492 = vmatprep.subr.msk.bf16.mxu0 %vm491_vm6, %v490_v17  ;;  %v269_v19 = vpop.permute.xlu1 %268 }
  0xb8   : > { %495 = vmatpush3.bf16.msk.msra.mxu0 %vm491_vm6, %v490_v17 }
  0xb9   : > { %485 = vmatprep.subr.msk.mxu0 %vm243_vm5, %v231_v1 }
  0xbb   : > { %v264_v23 = vpop.permute.xlu1 %263 }
  0xbc   : > { %486 = vmatpush3.msk.msra.mxu0 %vm243_vm5, %v231_v1 }
  0xbd   : > { %488 = vmatmul.mubr.msk.f32.vlgmr.msra.gmra.mrb[0].mxu0 %vm271_vm0, %v258_v18 }
 0x190   : > { %v489_v20 = vpop.f32.mrb[0].mxu0 }
 0x191   : > { %v350_v21 = vadd.f32 %v489_v20, %v269_v19  ;;  %v344_v22 = vpop.f32.mrb[1].mxu0 }
 0x192   : > { %v345_v25 = vadd.f32 %v344_v22, %v264_v23 }
 0x193   : > { %v353_v24 = vmul.f32 0.5, %v350_v21 }
 0x195   : > { %567 = vtanh.f32 %v353_v24 }
 0x196   : > { %569 = vtanh.f32 %v345_v25 }
 0x19f   : > { %v568_v26 = vpop.eup %567 }
 0x1a0   : > { %v355_v27 = vadd.f32 1.0, %v568_v26  ;;  %v570_v29 = vpop.eup %569 }
 0x1a2   : > { %v356_v28 = vmul.f32 0.5, %v355_v27 }
 0x1a4   : > { %v358_v30 = vmul.f32 %v570_v29, %v356_v28 }
 0x1a6   : > { %359 = vst [vmem:[%s223_s8] sm:$0xff] %v358_v30 }
 0x1a7   : > { %612 = shalt.err (!%p609_p6)
}
 0x1a8   : > { %s613_s14 = scalar_lea.hbm %s830_s10, 128  ;;  %s617_s24 = scalar_lea.hbm %s881_s4, 256 }
 0x1a9   : > { %p614_p7 = scmp.ne.s32.totalorder %s830_s10, %s613_s14  ;;  %p618_p0 = scmp.lt.u32.totalorder %s830_s10, %s881_s4 }
 0x1aa   : > { %p619_p2 = scmp.lt.u32.totalorder %s617_s24, %s613_s14  ;;  %p621_p8 = scmp.lt.u32.totalorder %s613_s14, %s830_s10 }
 0x1ab   : > { %p615_p9 = pnand %p614_p7, %p893_p10 }
 0x1ac   : > { %p620_p4 = por %p619_p2, %p618_p0 }
 0x1ad   : > { %p616_p12 = pneg %p615_p9 }
 0x1ae   : > { %p622_p11 = por %p621_p8, %p620_p4 }
 0x1b0   : > { %p623_p13 = pnand %p622_p11, %p616_p12 }
 0x1b2   : > { %626 = shalt.err (!%p623_p13)
}
 0x1b3   : > { %500 = dma.vmem_to_hbm [thread:$0]  (%p893_p10), %s832_s9, 128, %s830_s10, %s361_s30  }
 0x1b4 PF: > { %p512_p1 = scmp.ge.s32.totalorder %s681_s20, 2  ;;  %s387_s7 = sand.u32 1, %s661_s15  }
 0x1b5   : > { %p894_p3 = scmp.ne.s32.totalorder %s887_s27, 0  ;;  %s388_s8 = scalar_lea.sflag [#allocation4], %s387_s7 }
 0x1b7   : > { %p507_p5 = pnand %p512_p1, %p894_p3 }
 0x1b9   : > { %656 = dma.done.wait (!%p507_p5), %s388_s8, 128  }
 0x1ba   : > { %658 = vsyncadd (!%p507_p5), %s388_s8, 4294967168  ;;  %s18_s20 = sadd.s32 1, %s681_s20   ;;  %s895_s15 = smov %s665_s16 }
 0x1bb   : > { %p15_p6 = scmp.ge.s32.totalorder %s18_s20, 4   ;;  %s896_s16 = smov %s669_s17 }
 0x1bc   : > { %s897_s17 = smov %s766_s28  ;;  %s898_s18 = smov %s677_s19 }
 0x1bd   : > { %s899_s19 = smov %s901_s23  ;;  %17 = sbr.rel (!%p15_p6) target bundleno = 5 (0x5), region = 76 }
 0x1c4   :  { %393 = vsyncpa [#allocation3], 1 }
 0x1c5   :  { %395 = vsyncpa [#allocation3 + $0x1], 1 }
 0x1c6   :  { %396 = vsyncpa [#allocation4], 1 }
 0x1c7   :  { %398 = vsyncpa [#allocation4 + $0x1], 1 }

</bundles_post_ra>
